<compile_context>
chip_gen: v5e
topology: v5e:2x2
jax: 0.10.0
libtpu: 0.0.40
codegen_flags: <defaults>
</compile_context>

<pallas_src>
import functools

import jax
import jax.numpy as jnp
from jax.experimental import pallas as pl
from jax.experimental.pallas import tpu as pltpu


def _round_up(x, m):
    return ((x + m - 1) // m) * m


def _is_v5e():
    try:
        kind = jax.devices()[0].device_kind.lower()
        return ("v5 lite" in kind) or ("v5e" in kind) or ("v5lite" in kind)
    except Exception:
        return False


def _vmem_cap_bytes():
    # v5e/v6e have 128 MiB VMEM per TensorCore, v7x only 64 MiB; ask the
    # runtime instead of hard-coding, and leave 25% headroom for Mosaic.
    try:
        cap = getattr(pltpu.get_tpu_info(), "vmem_capacity_bytes", None)
        if cap:
            return int(0.75 * cap)
    except Exception:
        pass
    return 48 * 2 ** 20


def _halo_index_map(r):
    def index_map(b, t):
        # block index of the H rows immediately preceding the current tile
        # (clamped/duplicated at t == 0; that tile is masked in the kernel).
        return (b, jnp.maximum(t * r - 1, 0), 0)
    return index_map


def _residual_block_kernel(xhalo_ref, xcur_ref, w1_ref, b1_ref, w2_ref,
                           b2_ref, *rest, K, dilation, TB, H, padh, C_out_p,
                           has_res, fold_res):
    """One (batch, time-tile) grid step.

    xhalo_ref : (1, H, C_in_p)   H halo rows before the tile (masked at t==0)
    xcur_ref  : (1, TB, C_in_p)  current time tile (bf16)
    w1_ref    : (K*C_in_p, C1)   im2col-packed dcc1 weights (bf16); when the
                                 residual conv is folded, columns
                                 [C_out_p:2*C_out_p] hold the 1x1 res conv.
    w2_ref    : (K*C_out_p, C_out_p)  im2col-packed dcc2 weights (bf16)
    b*_ref    : (1, C1) / (1, C_out_p) f32
    wres/bres : residual 1x1 conv (only when has_res and not folded)
    out_ref   : (1, TB, C_out_p)
    """
    if has_res and not fold_res:
        wres_ref, bres_ref, out_ref = rest
    else:
        (out_ref,) = rest

    t = pl.program_id(1)
    Th = TB + padh                       # hidden rows recomputed per tile

    xcur = xcur_ref[0]                                   # (TB, C_in_p) bf16
    # zero the halo rows at the causal left boundary (t == 0)
    keep_halo = jnp.where(t > 0, 1.0, 0.0).astype(xcur.dtype)
    xhalo = xhalo_ref[0] * keep_halo                     # (H, C_in_p)
    x2 = jnp.concatenate([xhalo, xcur], axis=0)          # (H + TB, C_in_p)

    # ---- dcc1: K dilated taps fused into one MXU contraction ----
    taps1 = [x2[H - padh - (K - 1 - k) * dilation:
                H + TB - (K - 1 - k) * dilation, :] for k in range(K)]
    a1 = jnp.concatenate(taps1, axis=-1)                 # (Th, K*C_in_p) bf16
    acc1 = (jnp.dot(a1, w1_ref[...], preferred_element_type=jnp.float32)
            + b1_ref[...])
    if fold_res:
        h = jnp.maximum(acc1[:, :C_out_p], 0.0)
        res = acc1[padh:, C_out_p:]      # xcur @ wres + bres  (TB, C_out_p)
    else:
        h = jnp.maximum(acc1, 0.0)
    # drop1: identity in eval mode
    # TODO(synk): training-mode dropout (needs pltpu PRNG + keep-prob scaling).

    # causal zero padding of h for dcc2: rows before global time 0 are zero.
    # Only the first padh rows of the t == 0 tile ever hit the predicate; for
    # interior tiles it is all-true (few-% VALU cost, kept for simplicity).
    row_g = jax.lax.broadcasted_iota(jnp.int32, (Th, 1), 0) + (t * TB - padh)
    h = jnp.where(row_g >= 0, h, 0.0)
    h_lo = h.astype(xcur.dtype)                          # bf16 MXU operand

    # ---- dcc2: fused taps again ----
    taps2 = [h_lo[padh - (K - 1 - k) * dilation:
                  padh - (K - 1 - k) * dilation + TB, :] for k in range(K)]
    a2 = jnp.concatenate(taps2, axis=-1)                 # (TB, K*C_out_p)
    o = (jnp.dot(a2, w2_ref[...], preferred_element_type=jnp.float32)
         + b2_ref[...])
    o = jnp.maximum(o, 0.0)
    # drop2: identity in eval mode

    # ---- residual branch ----
    if has_res:
        if not fold_res:
            res = (jnp.dot(xcur, wres_ref[...],
                           preferred_element_type=jnp.float32)
                   + bres_ref[...])
    else:
        res = xcur.astype(jnp.float32)

    out_ref[0] = jnp.maximum(o + res, 0.0).astype(out_ref.dtype)


# --------------------- one-time per-block weight packing -------------------- #

def pack_residual_block_params(params, *, in_channels, out_channels,
                               kernel_size, fold_residual):
    """(O, I, K) Conv1d weights -> im2col-packed, 128-padded bf16 operands."""
    C_in, C_out, K = in_channels, out_channels, kernel_size
    C_in_p = _round_up(C_in, 128)
    C_out_p = _round_up(C_out, 128)
    has_res = C_in != C_out
    fold_res = bool(fold_residual) and has_res
    C1 = 2 * C_out_p if fold_res else C_out_p
    f32, bf16 = jnp.float32, jnp.bfloat16

    w1 = jnp.transpose(params["w1_oik"], (2, 1, 0))           # (K, C_in, C_out)
    w1p = jnp.zeros((K, C_in_p, C1), f32).at[:, :C_in, :C_out].set(w1)
    b1p = jnp.zeros((1, C1), f32).at[0, :C_out].set(params["b1"])
    if fold_res:
        wres = jnp.transpose(params["wres_oik"][:, :, 0])     # (C_in, C_out)
        w1p = w1p.at[K - 1, :C_in, C_out_p:C_out_p + C_out].set(wres)
        b1p = b1p.at[0, C_out_p:C_out_p + C_out].set(params["bres"])

    w2 = jnp.transpose(params["w2_oik"], (2, 1, 0))           # (K, C_out, C_out)
    w2p = jnp.zeros((K, C_out_p, C_out_p), f32).at[:, :C_out, :C_out].set(w2)
    b2p = jnp.zeros((1, C_out_p), f32).at[0, :C_out].set(params["b2"])

    packed = {
        "w1": w1p.reshape(K * C_in_p, C1).astype(bf16),
        "b1": b1p,
        "w2": w2p.reshape(K * C_out_p, C_out_p).astype(bf16),
        "b2": b2p,
        "meta": dict(C_in=C_in, C_out=C_out, C_in_p=C_in_p, C_out_p=C_out_p,
                     K=K, has_res=has_res, fold_res=fold_res),
    }
    if has_res and not fold_res:
        wresp = jnp.zeros((C_in_p, C_out_p), f32)
        wresp = wresp.at[:C_in, :C_out].set(
            jnp.transpose(params["wres_oik"][:, :, 0]))
        packed["wres"] = wresp.astype(bf16)
        packed["bres"] = jnp.zeros((1, C_out_p), f32).at[0, :C_out].set(
            params["bres"])
    return packed


# ----------------------- stack-friendly (NTC) entry point ------------------- #

def residual_block_pallas_ntc(xp, packed, *, dilation, t_block=None,
                              out_dtype=jnp.bfloat16):
    """Run one ResidualBlock on activations already in TPU-friendly layout.

    xp: (N, T, C_in_p) bf16, channels zero-padded to a multiple of 128.
    Returns (N, Tp, C_out_p) out_dtype with Tp = T rounded up to the time
    tile.  Stacked TCN blocks should stay in this layout between blocks.
    """
    meta = packed["meta"]
    K, C_in_p, C_out_p = meta["K"], meta["C_in_p"], meta["C_out_p"]
    has_res, fold_res = meta["has_res"], meta["fold_res"]
    C1 = 2 * C_out_p if fold_res else C_out_p

    N, T, _ = xp.shape
    pad = dilation * (K - 1)
    padh = _round_up(pad, 8)                  # sublane-rounded hidden halo
    H = max(8, _round_up(pad + padh, 8))      # x halo rows actually consumed

    # time tile: multiple of H (so the halo block index is exact), >= H
    tb_target = min(512, _round_up(T, 8)) if t_block is None else t_block
    TB = max(H, _round_up(tb_target, H))
    Tp = _round_up(T, TB)
    # v7x has two TensorCores: make sure the "parallel" grid has >= 2 steps.
    if N * (Tp // TB) < 2:
        tb2 = max(H, _round_up(-(-T // 2), H))
        if tb2 < TB:
            TB = tb2
            Tp = _round_up(T, TB)
    n_t = Tp // TB

    if Tp != T:                               # right-pad T (causal => harmless)
        xp = jnp.pad(xp, ((0, 0), (0, Tp - T), (0, 0)))

    operands = [xp, xp, packed["w1"], packed["b1"], packed["w2"], packed["b2"]]
    in_specs = [
        # halo: only the H rows preceding the current tile (masked at t == 0)
        pl.BlockSpec((1, H, C_in_p), _halo_index_map(TB // H)),
        # current time tile
        pl.BlockSpec((1, TB, C_in_p), lambda b, t: (b, t, 0)),
        pl.BlockSpec((K * C_in_p, C1), lambda b, t: (0, 0)),
        pl.BlockSpec((1, C1), lambda b, t: (0, 0)),
        pl.BlockSpec((K * C_out_p, C_out_p), lambda b, t: (0, 0)),
        pl.BlockSpec((1, C_out_p), lambda b, t: (0, 0)),
    ]
    if has_res and not fold_res:
        operands += [packed["wres"], packed["bres"]]
        in_specs += [pl.BlockSpec((C_in_p, C_out_p), lambda b, t: (0, 0)),
                     pl.BlockSpec((1, C_out_p), lambda b, t: (0, 0))]
    # TODO(synk): pipeline_mode=pl.Buffered(1) on the constant weight/bias
    # specs (v7x VMEM saving) and deeper buffering on x/out if DMA is exposed.

    kernel = functools.partial(
        _residual_block_kernel, K=K, dilation=dilation, TB=TB, H=H, padh=padh,
        C_out_p=C_out_p, has_res=has_res, fold_res=fold_res)

    # explicit VMEM budget: double-buffered tiles + weights + in-kernel temps
    Th = TB + padh
    out_isz = jnp.dtype(out_dtype).itemsize
    w_bytes = ((K * C_in_p * C1 + K * C_out_p * C_out_p) * 2
               + (C1 + C_out_p) * 4)
    if has_res and not fold_res:
        w_bytes += C_in_p * C_out_p * 2 + C_out_p * 4
    est = (2 * (H + TB) * C_in_p * 2            # x halo + cur tiles (bf16)
           + 2 * TB * C_out_p * out_isz         # out tile
           + 2 * w_bytes                        # weights / biases
           + ((H + TB) * C_in_p + Th * K * C_in_p + TB * K * C_out_p) * 2
           + (Th * C1 + 2 * TB * C_out_p) * 4)  # f32 temporaries
    vmem_limit = int(min(_vmem_cap_bytes(), 2 * est + (8 << 20)))

    return pl.pallas_call(
        kernel,
        out_shape=jax.ShapeDtypeStruct((N, Tp, C_out_p), out_dtype),
        grid_spec=pltpu.PrefetchScalarGridSpec(
            num_scalar_prefetch=0,
            grid=(N, n_t),
            in_specs=in_specs,
            out_specs=pl.BlockSpec((1, TB, C_out_p), lambda b, t: (b, t, 0)),
        ),
        compiler_params=pltpu.CompilerParams(
            dimension_semantics=("parallel", "parallel"),
            vmem_limit_bytes=vmem_limit),
    )(*operands)


# ------------------------- standalone (NCW) wrapper ------------------------- #

def residual_block_pallas(x_nct, params, *, kernel_size, dilation,
                          t_block=None, fold_residual=None,
                          out_dtype=jnp.bfloat16):
    """x_nct: (N, C_in, T) float32, PyTorch Conv1d (NCW) layout.

    Convenience wrapper for a single block.  A stacked TCN should keep
    activations in the padded (N, Tp, C_p) bf16 layout and call
    residual_block_pallas_ntc per block, so the NCW<->NTC transposes and
    channel padding (full-tensor HBM round trips) are paid once per stack.
    """
    N, C_in, T = x_nct.shape
    C_out = params["w1_oik"].shape[0]
    C_in_p = _round_up(C_in, 128)
    C_out_p = _round_up(C_out, 128)
    has_res = C_in != C_out
    if fold_residual is None:
        # The 1x1 residual conv rides the idle half of the 256-wide v6e/v7x
        # MXU for free; on v5e (128-wide MXU) keep it as a separate matmul.
        fold_residual = has_res and C_out_p == 128 and not _is_v5e()

    packed = pack_residual_block_params(
        params, in_channels=C_in, out_channels=C_out,
        kernel_size=kernel_size, fold_residual=fold_residual)

    x_ntc = jnp.transpose(x_nct, (0, 2, 1))
    xp = jnp.zeros((N, T, C_in_p), jnp.bfloat16)
    xp = xp.at[:, :, :C_in].set(x_ntc.astype(jnp.bfloat16))

    out_p = residual_block_pallas_ntc(xp, packed, dilation=dilation,
                                      t_block=t_block, out_dtype=out_dtype)
    # drop channel/time padding, NTC -> NCW to match the PyTorch module
    return jnp.transpose(out_p[:, :T, :C_out], (0, 2, 1))


# ------------------------- parameter construction ------------------------- #

def make_params(key, in_channels, out_channels, kernel_size):
    """Deterministic synthetic params; weight_norm applied here (glue)."""
    k1, k2, k3, k4, k5, k6, k7, k8 = jax.random.split(key, 8)

    def xavier(k, shape):                     # (O, I, K) Conv1d weight layout
        fan_out = shape[0] * shape[2]
        fan_in = shape[1] * shape[2]
        bound = (6.0 / (fan_in + fan_out)) ** 0.5
        return jax.random.uniform(k, shape, jnp.float32, -bound, bound)

    def weight_norm(v, g):                    # PyTorch weight_norm, dim=0
        norm = jnp.sqrt(jnp.sum(v * v, axis=(1, 2), keepdims=True))
        return g[:, None, None] * v / norm

    v1 = xavier(k1, (out_channels, in_channels, kernel_size))
    g1 = jax.random.uniform(k2, (out_channels,), jnp.float32, 0.5, 1.5)
    v2 = xavier(k3, (out_channels, out_channels, kernel_size))
    g2 = jax.random.uniform(k4, (out_channels,), jnp.float32, 0.5, 1.5)

    params = {
        "w1_oik": weight_norm(v1, g1),
        "w2_oik": weight_norm(v2, g2),
        "b1": 0.1 * jax.random.normal(k5, (out_channels,), jnp.float32),
        "b2": 0.1 * jax.random.normal(k6, (out_channels,), jnp.float32),
    }
    if in_channels != out_channels:
        params["wres_oik"] = xavier(k7, (out_channels, in_channels, 1))
        params["bres"] = 0.1 * jax.random.normal(
            k8, (out_channels,), jnp.float32)
    return params


# ------------------------------ JAX reference ------------------------------ #

def reference_forward(x_nct, params, *, kernel_size, dilation,
                      bf16_operands=True, out_dtype=None):
    """Pure-JAX reference for the PyTorch ResidualBlock forward (eval mode).

    With bf16_operands=True the conv/matmul operands are rounded to bfloat16
    (accumulation stays f32) and the output is rounded to out_dtype, matching
    the kernel's MXU precision / output-store contract.
    """
    q = ((lambda a: a.astype(jnp.bfloat16).astype(jnp.float32))
         if bf16_operands else (lambda a: a))
    pad = dilation * (kernel_size - 1)

    def causal_conv(x, w_oik, b):
        xpad = jnp.pad(x, ((0, 0), (0, 0), (pad, 0)))
        y = jax.lax.conv_general_dilated(
            xpad, w_oik, window_strides=(1,), padding="VALID",
            rhs_dilation=(dilation,), dimension_numbers=("NCH", "OIH", "NCH"))
        return y + b[None, :, None]

    xq = q(x_nct)
    h = jax.nn.relu(causal_conv(xq, q(params["w1_oik"]), params["b1"]))
    h = q(h)                                    # kernel feeds h to MXU as bf16
    o = jax.nn.relu(causal_conv(h, q(params["w2_oik"]), params["b2"]))
    if "wres_oik" in params:
        res = (jnp.einsum("nct,oc->not", xq, q(params["wres_oik"][:, :, 0]))
               + params["bres"][None, :, None])
    else:
        res = xq
    out = jax.nn.relu(o + res)
    if out_dtype is not None:
        out = out.astype(out_dtype).astype(jnp.float32)
    return out


if __name__ == "__main__":
    key = jax.random.PRNGKey(0)
    configs = [
        # (N, C_in, C_out, T, kernel_size, dilation, t_block, fold_residual)
        (2, 4, 8, 32, 3, 2, 16, None),    # 1x1 residual, fold decided by chip
        (2, 4, 8, 48, 3, 2, None, False),  # 1x1 residual, separate res matmul
        (2, 8, 8, 32, 2, 1, None, None),  # identity residual path
    ]
    for i, (N, C_in, C_out, T, K, d, tb, fold) in enumerate(configs):
        kx, kp, key = jax.random.split(key, 3)
        x = jax.random.normal(kx, (N, C_in, T), jnp.float32)   # NCW, PyTorch
        params = make_params(kp, C_in, C_out, K)

        out = residual_block_pallas(x, params, kernel_size=K, dilation=d,
                                    t_block=tb, fold_residual=fold)
        out = jax.block_until_ready(out)
        assert out.shape == (N, C_out, T)
        out32 = out.astype(jnp.float32)

        # precision-matched reference (bf16 operands/output, f32 accumulation)
        ref = reference_forward(x, params, kernel_size=K, dilation=d,
                                out_dtype=out.dtype)
        err = float(jnp.max(jnp.abs(out32 - ref)))
        assert err < 3e-2, f"config {i}: max abs err vs matched ref {err}"

        # coarse sanity bound vs the pure-f32 reference
        ref32 = reference_forward(x, params, kernel_size=K, dilation=d,
                                  bf16_operands=False)
        assert jnp.allclose(out32, ref32, atol=1e-1, rtol=5e-2), (
            f"config {i}: f32-ref max abs err "
            f"{float(jnp.max(jnp.abs(out32 - ref32)))}")

    print("KERNEL_OK")
</pallas_src>

<mosaic_0001>
module attributes {stable_mosaic.version = 11 : i64} {
  func.func @_residual_block_kernel(%arg0: i32, %arg1: i32, %arg2: memref<1x16x128xbf16, #tpu.memory_space<vmem>>, %arg3: memref<1x16x128xbf16, #tpu.memory_space<vmem>>, %arg4: memref<384x256xbf16, #tpu.memory_space<vmem>>, %arg5: memref<1x256xf32, #tpu.memory_space<vmem>>, %arg6: memref<384x128xbf16, #tpu.memory_space<vmem>>, %arg7: memref<1x128xf32, #tpu.memory_space<vmem>>, %arg8: memref<1x16x128xbf16, #tpu.memory_space<vmem>>) attributes {dimension_semantics = [#tpu.dimension_semantics<parallel>, #tpu.dimension_semantics<parallel>], iteration_bounds = array<i64: 2, 2>, scalar_prefetch = 0 : i64, scratch_operands = 0 : i64, tpu.core_type = #tpu.core_type<tc>, window_params = [{transform_indices = @transform_0, window_bounds = array<i64: 1, 16, 128>}, {transform_indices = @transform_1, window_bounds = array<i64: 1, 16, 128>}, {pipeline_mode = #tpu.pipeline_mode<synchronous>, transform_indices = @transform_2, window_bounds = array<i64: 384, 256>}, {pipeline_mode = #tpu.pipeline_mode<synchronous>, transform_indices = @transform_3, window_bounds = array<i64: 1, 256>}, {pipeline_mode = #tpu.pipeline_mode<synchronous>, transform_indices = @transform_4, window_bounds = array<i64: 384, 128>}, {pipeline_mode = #tpu.pipeline_mode<synchronous>, transform_indices = @transform_5, window_bounds = array<i64: 1, 128>}, {transform_indices = @transform_6, window_bounds = array<i64: 1, 16, 128>}]} {
    %c0 = arith.constant 0 : index
    %c0_0 = arith.constant 0 : index
    %c0_1 = arith.constant 0 : index
    %0 = vector.load %arg3[%c0, %c0_0, %c0_1] : memref<1x16x128xbf16, #tpu.memory_space<vmem>>, vector<1x16x128xbf16>
    %1 = vector.shape_cast %0 : vector<1x16x128xbf16> to vector<16x128xbf16>
    %c0_i32 = arith.constant 0 : i32
    %2 = arith.cmpi sgt, %arg1, %c0_i32 : i32
    %cst = arith.constant 1.000000e+00 : f32
    %cst_2 = arith.constant 0.000000e+00 : f32
    %3 = arith.select %2, %cst, %cst_2 : f32
    %4 = arith.truncf %3 : f32 to bf16
    %c0_3 = arith.constant 0 : index
    %c0_4 = arith.constant 0 : index
    %c0_5 = arith.constant 0 : index
    %5 = vector.load %arg2[%c0_3, %c0_4, %c0_5] : memref<1x16x128xbf16, #tpu.memory_space<vmem>>, vector<1x16x128xbf16>
    %6 = vector.shape_cast %5 : vector<1x16x128xbf16> to vector<16x128xbf16>
    %7 = vector.broadcast %4 : bf16 to vector<16x128xbf16>
    %8 = arith.mulf %6, %7 : vector<16x128xbf16>
    %9 = tpu.concatenate %8, %1 in 0 : vector<16x128xbf16>, vector<16x128xbf16> -> vector<32x128xbf16>
    %10 = vector.extract_strided_slice %9 {offsets = [4, 0], sizes = [24, 128], strides = [1, 1]} : vector<32x128xbf16> to vector<24x128xbf16>
    %11 = vector.extract_strided_slice %9 {offsets = [6, 0], sizes = [24, 128], strides = [1, 1]} : vector<32x128xbf16> to vector<24x128xbf16>
    %12 = vector.extract_strided_slice %9 {offsets = [8, 0], sizes = [24, 128], strides = [1, 1]} : vector<32x128xbf16> to vector<24x128xbf16>
    %13 = tpu.concatenate %10, %11, %12 in 1 : vector<24x128xbf16>, vector<24x128xbf16>, vector<24x128xbf16> -> vector<24x384xbf16>
    %c0_6 = arith.constant 0 : index
    %c0_7 = arith.constant 0 : index
    %14 = vector.load %arg4[%c0_6, %c0_7] : memref<384x256xbf16, #tpu.memory_space<vmem>>, vector<384x256xbf16>
    %cst_8 = arith.constant dense<0.000000e+00> : vector<24x256xf32>
    %15 = tpu.matmul %13, %14, %cst_8 {dimension_numbers = #tpu.dot_dimension_numbers<[1], [0], [0], [1], [0, 0, 1, 1], [], []>} : vector<24x384xbf16>, vector<384x256xbf16>, vector<24x256xf32> -> vector<24x256xf32>
    %c0_9 = arith.constant 0 : index
    %c0_10 = arith.constant 0 : index
    %16 = vector.load %arg5[%c0_9, %c0_10] : memref<1x256xf32, #tpu.memory_space<vmem>>, vector<1x256xf32>
    %17 = vector.broadcast %16 : vector<1x256xf32> to vector<24x256xf32>
    %18 = arith.addf %15, %17 : vector<24x256xf32>
    %19 = vector.extract_strided_slice %18 {offsets = [0, 0], sizes = [24, 128], strides = [1, 1]} : vector<24x256xf32> to vector<24x128xf32>
    %cst_11 = arith.constant 0.000000e+00 : f32
    %20 = vector.broadcast %cst_11 : f32 to vector<24x128xf32>
    %21 = arith.maximumf %19, %20 : vector<24x128xf32>
    %22 = vector.extract_strided_slice %18 {offsets = [8, 128], sizes = [16, 128], strides = [1, 1]} : vector<24x256xf32> to vector<16x128xf32>
    %23 = tpu.iota {dimensions = array<i32: 0>} : vector<24x1xi32>
    %c16_i32 = arith.constant 16 : i32
    %24 = arith.muli %arg1, %c16_i32 : i32
    %c8_i32 = arith.constant 8 : i32
    %25 = arith.subi %24, %c8_i32 : i32
    %26 = vector.broadcast %25 : i32 to vector<24x1xi32>
    %27 = arith.addi %23, %26 : vector<24x1xi32>
    %c0_i32_12 = arith.constant 0 : i32
    %28 = vector.broadcast %c0_i32_12 : i32 to vector<24x1xi32>
    %29 = arith.cmpi sge, %27, %28 : vector<24x1xi32>
    %cst_13 = arith.constant 0.000000e+00 : f32
    %30 = vector.shape_cast %29 : vector<24x1xi1> to vector<24x1xi1>
    %31 = vector.broadcast %30 : vector<24x1xi1> to vector<24x128xi1>
    %32 = vector.broadcast %cst_13 : f32 to vector<24x128xf32>
    %33 = arith.select %31, %21, %32 : vector<24x128xi1>, vector<24x128xf32>
    %34 = arith.truncf %33 : vector<24x128xf32> to vector<24x128xbf16>
    %35 = vector.extract_strided_slice %34 {offsets = [4, 0], sizes = [16, 128], strides = [1, 1]} : vector<24x128xbf16> to vector<16x128xbf16>
    %36 = vector.extract_strided_slice %34 {offsets = [6, 0], sizes = [16, 128], strides = [1, 1]} : vector<24x128xbf16> to vector<16x128xbf16>
    %37 = vector.extract_strided_slice %34 {offsets = [8, 0], sizes = [16, 128], strides = [1, 1]} : vector<24x128xbf16> to vector<16x128xbf16>
    %38 = tpu.concatenate %35, %36, %37 in 1 : vector<16x128xbf16>, vector<16x128xbf16>, vector<16x128xbf16> -> vector<16x384xbf16>
    %c0_14 = arith.constant 0 : index
    %c0_15 = arith.constant 0 : index
    %39 = vector.load %arg6[%c0_14, %c0_15] : memref<384x128xbf16, #tpu.memory_space<vmem>>, vector<384x128xbf16>
    %cst_16 = arith.constant dense<0.000000e+00> : vector<16x128xf32>
    %40 = tpu.matmul %38, %39, %cst_16 {dimension_numbers = #tpu.dot_dimension_numbers<[1], [0], [0], [1], [0, 0, 1, 1], [], []>} : vector<16x384xbf16>, vector<384x128xbf16>, vector<16x128xf32> -> vector<16x128xf32>
    %c0_17 = arith.constant 0 : index
    %c0_18 = arith.constant 0 : index
    %41 = vector.load %arg7[%c0_17, %c0_18] : memref<1x128xf32, #tpu.memory_space<vmem>>, vector<1x128xf32>
    %42 = vector.broadcast %41 : vector<1x128xf32> to vector<16x128xf32>
    %43 = arith.addf %40, %42 : vector<16x128xf32>
    %cst_19 = arith.constant 0.000000e+00 : f32
    %44 = vector.broadcast %cst_19 : f32 to vector<16x128xf32>
    %45 = arith.maximumf %43, %44 : vector<16x128xf32>
    %46 = arith.addf %45, %22 : vector<16x128xf32>
    %cst_20 = arith.constant 0.000000e+00 : f32
    %47 = vector.broadcast %cst_20 : f32 to vector<16x128xf32>
    %48 = arith.maximumf %46, %47 : vector<16x128xf32>
    %49 = arith.truncf %48 : vector<16x128xf32> to vector<16x128xbf16>
    %c0_21 = arith.constant 0 : index
    %c0_22 = arith.constant 0 : index
    %c0_23 = arith.constant 0 : index
    %50 = vector.load %arg8[%c0_21, %c0_22, %c0_23] : memref<1x16x128xbf16, #tpu.memory_space<vmem>>, vector<1x16x128xbf16>
    %51 = vector.shape_cast %50 : vector<1x16x128xbf16> to vector<16x128xbf16>
    %52 = vector.shape_cast %49 : vector<16x128xbf16> to vector<1x16x128xbf16>
    tpu.vector_store %arg8[%c0_21, %c0_22, %c0_23], %52 {strides = array<i32>} : memref<1x16x128xbf16, #tpu.memory_space<vmem>>, vector<1x16x128xbf16>,
    return
  }
  func.func @transform_0(%arg0: i32, %arg1: i32) -> (i32, i32, i32) {
    %c1_i32 = arith.constant 1 : i32
    %0 = arith.muli %arg1, %c1_i32 : i32
    %c1_i32_0 = arith.constant 1 : i32
    %1 = arith.subi %0, %c1_i32_0 : i32
    %c0_i32 = arith.constant 0 : i32
    %2 = arith.maxsi %1, %c0_i32 : i32
    %c0_i32_1 = arith.constant 0 : i32
    %c0_i32_2 = arith.constant 0 : i32
    return %arg0, %2, %c0_i32_1 : i32, i32, i32
  }
  func.func @transform_1(%arg0: i32, %arg1: i32) -> (i32, i32, i32) {
    %c0_i32 = arith.constant 0 : i32
    %c0_i32_0 = arith.constant 0 : i32
    return %arg0, %arg1, %c0_i32 : i32, i32, i32
  }
  func.func @transform_2(%arg0: i32, %arg1: i32) -> (i32, i32) {
    %c0_i32 = arith.constant 0 : i32
    %c0_i32_0 = arith.constant 0 : i32
    %c0_i32_1 = arith.constant 0 : i32
    return %c0_i32, %c0_i32_0 : i32, i32
  }
  func.func @transform_3(%arg0: i32, %arg1: i32) -> (i32, i32) {
    %c0_i32 = arith.constant 0 : i32
    %c0_i32_0 = arith.constant 0 : i32
    %c0_i32_1 = arith.constant 0 : i32
    return %c0_i32, %c0_i32_0 : i32, i32
  }
  func.func @transform_4(%arg0: i32, %arg1: i32) -> (i32, i32) {
    %c0_i32 = arith.constant 0 : i32
    %c0_i32_0 = arith.constant 0 : i32
    %c0_i32_1 = arith.constant 0 : i32
    return %c0_i32, %c0_i32_0 : i32, i32
  }
  func.func @transform_5(%arg0: i32, %arg1: i32) -> (i32, i32) {
    %c0_i32 = arith.constant 0 : i32
    %c0_i32_0 = arith.constant 0 : i32
    %c0_i32_1 = arith.constant 0 : i32
    return %c0_i32, %c0_i32_0 : i32, i32
  }
  func.func @transform_6(%arg0: i32, %arg1: i32) -> (i32, i32, i32) {
    %c0_i32 = arith.constant 0 : i32
    %c0_i32_0 = arith.constant 0 : i32
    return %arg0, %arg1, %c0_i32 : i32, i32, i32
  }
}

</mosaic_0001>

<bundles_post_ra>
// kernel: tpu_custom_call.1
= control target key start
LH: loop header
LB: loop body
LE: loop exit
PB: predicated region body
PF: predicated region fallthrough
CT: control target
= control target key end

     0   :  { %s2454_s0 = inlined_call_operand.hbm [shape: bf16[2,32,128], index: 0, kind: input, shape index: {}]   ;;  %s2455_s1 = inlined_call_operand.hbm [shape: bf16[2,32,128], index: 1, kind: input, shape index: {}]   ;;  %s2456_s2 = inlined_call_operand.hbm [shape: bf16[384,256], index: 2, kind: input, shape index: {}]   ;;  %s2457_s3 = inlined_call_operand.vmem [shape: f32[1,256], index: 3, kind: input, shape index: {}]   ;;  %s2458_s4 = inlined_call_operand.hbm [shape: bf16[384,128], index: 4, kind: input, shape index: {}]   ;;  %s2459_s5 = inlined_call_operand.vmem [shape: f32[1,128], index: 5, kind: input, shape index: {}]   ;;  %s2460_s6 = inlined_call_operand.hbm [shape: bf16[2,32,128], index: 6, kind: output, shape index: {}]  }
   0x1   :  { %2473 = sst [smem:[#allocation23_spill]] %s2454_s0 }
   0x2   :  { %2474 = sst [smem:[#allocation24_spill]] %s2456_s2 }
   0x3   :  { %2475 = sst [smem:[#allocation25_spill]] %s2458_s4 }
   0x4   :  { %2476 = sst [smem:[#allocation26_spill]] %s2459_s5 }
   0x5   :  { %2477 = sst [smem:[#allocation27_spill]] %s2460_s6 }
   0x6   :  { %11 = vsyncpa [#allocation3], 0 }
   0x7   :  { %13 = vsyncpa [#allocation3 + $0x1], 0 }
   0x8   :  { %14 = vsyncpa [#allocation6], 0 }
   0x9   :  { %16 = vsyncpa [#allocation6 + $0x1], 0 }
   0xa   :  { %17 = vsyncpa [#allocation9], 0 }
   0xb   :  { %18 = vsyncpa [#allocation4], 0 }
   0xc   :  { %20 = vsyncpa [#allocation4 + $0x1], 0  ;;  %s2134_s21 = smov 0   ;;  %s2136_s22 = smov 0  }
   0xd   :  { %s2138_s23 = smov 0   ;;  %s2140_s24 = smov 0  }
   0xe   :  { %s2142_s25 = smov 0   ;;  %s2144_s26 = smov 0  }
   0xf   :  { %s2146_s27 = smov 0   ;;  %s2148_s28 = smov 0  }
  0x10   :  { %s2150_s29 = smov 0   ;;  %s2152_s30 = smov 0  }
  0x11   :  { %s2154_s7 = smov 0  }
  0x12 LB: > { %2478 = sst [smem:[#allocation16_spill]] %s2049_s21  ;;  %s2190_s8 = sadd.s32 4294967295, %s2089_s7   ;;  %s2089_s7 = sphi %s2154_s7, %s26_s7   ;;  %s2085_s30 = sphi %s2152_s30, %s2519_s30   ;;  %s2081_s29 = sphi %s2150_s29, %s2518_s29   ;;  %s2077_s28 = sphi %s2148_s28, %s2508_s28   ;;  %s2073_s27 = sphi %s2146_s27, %s2517_s27   ;;  %s2069_s26 = sphi %s2144_s26, %s2516_s26   ;;  %s2065_s25 = sphi %s2142_s25, %s2515_s25   ;;  %s2061_s24 = sphi %s2140_s24, %s2514_s24   ;;  %s2057_s23 = sphi %s2138_s23, %s2513_s23   ;;  %s2053_s22 = sphi %s2136_s22, %s2512_s22   ;;  %s2049_s21 = sphi %s2134_s21, %s2511_s21  }
  0x13   : > { %2479 = sst [smem:[#allocation17_spill]] %s2077_s28  ;;  %s1294_s9 = sadd.s32 4294967294, %s2089_s7  }
  0x14   : > { %2480 = sst [smem:[#allocation18_spill]] %s2085_s30  ;;  %p2470_p0 = scmp.eq.s32.totalorder %s2190_s8, 0 }
  0x15   : > { %p94_p1 = scmp.ne.s32.totalorder %s2053_s22, %s2049_s21  ;;  %p204_p2 = scmp.eq.s32.totalorder %s2190_s8, 3 }
  0x16   : > { %p210_p3 = scmp.eq.s32.totalorder %s1294_s9, 3  ;;  %p1297_p5 = scmp.ge.s32.totalorder %s2089_s7, 1 }
  0x17   : > { %p2199_p4 = por %p94_p1, %p2470_p0  ;;  %p217_p7 = scmp.lt.s32.totalorder %s2089_s7, 5 }
  0x18   : > { %p2204_p6 = por %p210_p3, %p94_p1  ;;  %s2484_s2 = sld [smem:[#allocation24_spill]] }
  0x19   : > { %p2212_p8 = pnand %p1297_p5, %p217_p7  ;;  %s2091_s16 = smov [#allocation7]  }
  0x1a   : > { %s2482_s11 = scalar_select %p2204_p6, 1, 0 }
  0x1b   : > { %p1713_p9 = pneg %p2212_p8  ;;  %s230_s17 = sshll.u32 %s2091_s16, 4  ;;  %s231_s17 = int_to_ptr.vmem [resolvable:$true] %s230_s17 }
  0x1c   : > { %2483 = sst [smem:[#allocation19_spill]] %s2482_s11  ;;  %s2092_s9 = smov 128  }
  0x1d   : > { %p1714_p10 = pnand %p1713_p9, %p2470_p0  ;;  %s2486_s4 = sld [smem:[#allocation25_spill]] }
  0x1e   : > { %s228_s14 = sshll.u32 %s2484_s2, 4  ;;  %s2093_s12 = smov 8   ;;  %s229_s14 = int_to_ptr.hbm [resolvable:$true] %s228_s14 }
  0x1f   : > { %1716 = dma.hbm_to_vmem [thread:$0]  (!%p1714_p10), %s229_s14, 6144, %s231_s17, [#allocation6], %s2092_s9, %s2092_s9, %s2093_s12  }
  0x20   : > { %s2094_s13 = smov [#allocation8]   ;;  %s2462_s16 = smov 64  }
  0x21   : > { %s247_s2 = sshll.u32 %s2094_s13, 4  ;;  %s2464_s11 = smov 4   ;;  %s248_s2 = int_to_ptr.vmem [resolvable:$true] %s247_s2 }
  0x22   : > { %s35_s18 = sadd.s32 1, %s2081_s29  ;;  %s38_s19 = sadd.s32 1, %s2085_s30 }
  0x23   : > { %s245_s20 = sshll.u32 %s2486_s4, 4  ;;  %p36_p11 = scmp.ge.s32.totalorder %s35_s18, 2  ;;  %s246_s20 = int_to_ptr.hbm [resolvable:$true] %s245_s20 }
  0x24   : > { %1719 = dma.hbm_to_vmem [thread:$0]  (!%p1714_p10), %s246_s20, 3072, %s248_s2, [#allocation9], %s2462_s16, %s2462_s16, %s2464_s11  }
  0x25   : > { %s53_s14 = sadd.s32 1, %s2069_s26  ;;  %s2521_s18 = smov (%p36_p11, %s35_s18), 0 }
  0x26   : > { %2487 = sst [smem:[#allocation20_spill]] %s2521_s18  ;;  %s2523_s19 = smov (!%p36_p11, %s38_s19), %s2085_s30 }
  0x27   : > { %p40_p12 = scmp.ge.s32.totalorder %s2523_s19, 2  ;;  %p60_p13 = scmp.ne.s32.totalorder %s2069_s26, %s2065_s25 }
  0x28   : > { %p61_p1 = scmp.eq.s32.totalorder %s2089_s7, 0  ;;  %p66_p3 = scmp.ne.s32.totalorder %s2065_s25, %s2061_s24 }
  0x29   : > { %s2525_s19 = smov (%p40_p12, %s2523_s19), 0  ;;  %s77_s9 = ssub.s32 %s2081_s29, %s2521_s18 }
  0x2a   : > { %2488 = sst [smem:[#allocation21_spill]] %s2525_s19  ;;  %s48_s17 = ssub.s32 %s2085_s30, %s2525_s19 }
  0x2b   : > { %p2243_p5 = por %p61_p1, %p60_p13  ;;  %p51_p7 = scmp.eq.s32.totalorder %s48_s17, 0 }
  0x2c   : > { %p2249_p9 = por %p2470_p0, %p66_p3  ;;  %p2471_p10 = scmp.lt.s32.totalorder %s2089_s7, 4 }
  0x2d   : > { %s2257_s12 = scalar_select %p51_p7, %s2069_s26, %s53_s14  }
  0x2e   : > { %s2259_s13 = sor.u32 %s77_s9, %s48_s17  ;;  %s264_s24 = sand.u32 1, %s2069_s26  }
  0x2f   : > { %2491 = sst [smem:[#allocation22_spill]] %s2257_s12  ;;  %p79_p11 = scmp.eq.s32.totalorder %s2259_s13, 0 }
  0x30   : > { %s1301_s16 = sshll.u32 %s264_s24, 3  ;;  %s1304_s11 = sshll.u32 %s2085_s30, 2 }
  0x31   : > { %s268_s4 = scalar_lea.vmem [#allocation2], %s1301_s16  ;;  %s2046_s21 = sshll.u32 %s2085_s30, 4 }
  0x32   : > { %s281_s19 = sshll.u32 %s268_s4, 4  ;;  %s2492_s0 = sld [smem:[#allocation23_spill]]  ;;  %s282_s19 = int_to_ptr.vmem [resolvable:$true] %s281_s19 }
  0x33   : > { %p2272_p12 = pnand %p2471_p10, %p2243_p5  ;;  %s1307_s9 = sshll.u32 %s2081_s29, 1 }
  0x34   : > { %s265_s18 = scalar_lea.sflag [#allocation3], %s264_s24 }
  0x35   : > { %p1898_p3 = pneg %p2272_p12 }
  0x38   : > { %s278_s28 = scalar_lea.hbm %s2492_s0, %s2046_s21 }
  0x39   : > { %s279_s17 = sshll.u32 %s278_s28, 4  ;;  %s280_s17 = int_to_ptr.hbm [resolvable:$true] %s279_s17 }
  0x3a   : > { %s1894_s12 = sshra.s32 %s280_s17, 4  ;;  %s1895_s12 = int_to_ptr.hbm [resolvable:$true] %s1894_s12 }
  0x3b   : > { %s1896_s4 = scalar_lea.hbm %s1895_s12, 8  ;;  %p1902_p5 = scmp.lt.s32.totalorder %s1895_s12, %s2492_s0 }
  0x3c   : > { %p1897_p13 = scmp.ne.s32.totalorder %s1895_s12, %s1896_s4 }
  0x3e   : > { %p1899_p7 = pnand %p1898_p3, %p1897_p13 }
  0x40   : > { %p1900_p0 = pneg %p1899_p7 }
  0x42   : > { %p1905_p10 = pnand %p1902_p5, %p1900_p0 }
  0x44   : > { %1908 = shalt.err (!%p1905_p10)
}
  0x45   : > { %s2494_s21 = smov 4   ;;  %s2495_s28 = smov 64  }
  0x46   : > { %1723 = dma.hbm_to_vmem [thread:$0]  (!%p2272_p12), %s280_s17, 128, %s282_s19, %s265_s18, %s2495_s28, %s2495_s28, %s2494_s21  }
  0x47   : > { %s300_s16 = sadd.s32 %s1307_s9, %s1304_s11  ;;  %s81_s4 = sadd.s32 1, %s2057_s23 }
  0x48   : > { %s1309_s2 = sshll.u32 %s300_s16, 2  ;;  %p88_p0 = scmp.ne.s32.totalorder %s2057_s23, %s2053_s22 }
  0x49   : > { %s302_s14 = scalar_lea.hbm %s2455_s1, %s1309_s2  ;;  %s291_s6 = sand.u32 1, %s2089_s7  }
  0x4a   : > { %s2294_s5 = scalar_select %p79_p11, %s2057_s23, %s81_s4  }
  0x4b   : > { %s293_s0 = sand.u32 1, %s2057_s23   ;;  %p90_p10 = por %p88_p0, %p61_p1 }
  0x4c   : > { %p2304_p13 = por %p204_p2, %p88_p0  ;;  %s1306_s11 = sshll.u32 %s293_s0, 3 }
  0x4d   : > { %s303_s18 = sshll.u32 %s302_s14, 4  ;;  %s295_s19 = scalar_lea.vmem [#allocation5], %s1306_s11  ;;  %s304_s18 = int_to_ptr.hbm [resolvable:$true] %s303_s18 }
  0x4e   : > { %s305_s17 = sshll.u32 %s295_s19, 4  ;;  %p2497_p12 = scmp.lt.s32.totalorder %s2089_s7, 4  ;;  %s306_s17 = int_to_ptr.vmem [resolvable:$true] %s305_s17 }
  0x4f   : > { %s292_s13 = scalar_lea.sflag [#allocation6], %s291_s6  ;;  %317 = sbr.rel (%p2212_p8) target bundleno = 452 (0x1c4), region = 44 }
  0x50   : > { %p1724_p3 = pnand %p2497_p12, %p90_p10  ;;  %s319_s9 = sand.u32 (!%p2212_p8), 1, %s2065_s25  }
  0x51   : > { %s2316_s16 = sshll.u32 (!%p2212_p8), %s319_s9, 3  ;;  %s320_s0 = scalar_lea.sflag (!%p2212_p8), [#allocation3], %s319_s9 }
  0x52   : > { %1726 = dma.hbm_to_vmem [thread:$0]  (!%p1724_p3), %s304_s18, 128, %s306_s17, %s292_s13, %s2495_s28, %s2495_s28, %s2494_s21  }
  0x53   : > { %s323_s2 = scalar_lea.vmem (!%p2212_p8), [#allocation2], %s2316_s16 }
  0x54   : > { %2027 = dma.done.wait (%p2249_p9), %s320_s0, 128  }
  0x55   : > { %2029 = vsyncadd (%p2249_p9), %s320_s0, 4294967168  ;;  %s329_s21 = sand.u32 1, %s2190_s8   ;;  %s331_s15 = sand.u32 1, %s2053_s22  }
  0x56   : > { %s2327_s28 = sshll.u32 %s331_s15, 3  ;;  %s330_s12 = scalar_lea.sflag [#allocation6], %s329_s21 }
  0x57   : > { %s333_s24 = scalar_lea.vmem [#allocation5], %s2327_s28 }
  0x58   : > { %2031 = dma.done.wait (%p2199_p4), %s330_s12, 128  }
  0x59   : > { %2033 = vsyncadd (%p2199_p4), %s330_s12, 4294967168  ;;  %p2498_p2 = scmp.eq.s32.totalorder %s2190_s8, 0 }
  0x5b   : > { %2035 = dma.done.wait (%p2498_p2), [#allocation6], 6144   ;;  %p2499_p8 = pmov %p2498_p2 }
  0x5c   : > { %p2500_p1 = pmov %p2498_p2 }
  0x5d   : > { %2037 = vsyncadd (%p2499_p8), [#allocation6], 4294961152 }
  0x5e   : > { %2039 = dma.done.wait (%p2500_p1), [#allocation9], 3072   ;;  %p2501_p9 = pmov %p2500_p1 }
  0x5f   : > { %p386_p11 = scmp.gt.s32.totalorder %s2073_s27, 0  ;;  %v1378_v0 = vld [vmem:[#allocation7 + $0x70] sm:$0xf]  ;;  %v1633_v1 = vld [vmem:[#allocation7 + $0x74] sm:$0xf0]  ;;  %v1691_v51 = vld [vmem:[%s323_s2] sm:$0xff]  }
  0x60   : > { %2041 = vsyncadd (%p2501_p9), [#allocation9], 4294964224  ;;  %v1442_v2 = vld [vmem:[#allocation7 + $0xf0] sm:$0xf]  ;;  %v1379_v3 = vor.u32 %v1633_v1, %v1378_v0  ;;  %v1649_v4 = vld [vmem:[#allocation7 + $0xf4] sm:$0xf0]  ;;  %v1692_v61 = vunpack.c.l.bf16 %v1691_v51  ;;  %v1693_v62 = vunpack.c.h.bf16 %v1691_v51 }
  0x61   : > { %s2343_s20 = scalar_select %p386_p11, 1.0, 0.0  ;;  %v1506_v5 = vld [vmem:[#allocation7 + $0x170] sm:$0xf]  ;;  %v1665_v6 = vld [vmem:[#allocation7 + $0x174] sm:$0xf0]  ;;  %v1443_v7 = vor.u32 %v1649_v4, %v1442_v2 }
  0x62   : > { %v1507_v8 = vor.u32 %v1665_v6, %v1506_v5  ;;  %v1370_v9 = vld [vmem:[#allocation7 + $0x60] sm:$0xf]  ;;  %v1631_v10 = vld [vmem:[#allocation7 + $0x64] sm:$0xf0]  ;;  %735 = vmatpush.bf16.msra.mxu0 %v1379_v3  ;;  %v1362_v18 = vld [vmem:[#allocation7 + $0x50] sm:$0xf] }
  0x63   : > { %s390_s14 = sshrl.u32 %s2343_s20, 16  ;;  %v1434_v11 = vld [vmem:[#allocation7 + $0xe0] sm:$0xf]  ;;  %v1371_v12 = vor.u32 %v1631_v10, %v1370_v9  ;;  %v1647_v13 = vld [vmem:[#allocation7 + $0xe4] sm:$0xf0]  ;;  %753 = vmatpush.bf16.msra.mxu1 %v1443_v7  ;;  %p389_p4 = scmp.ne.f32.partialorder %s2343_s20, %s2343_s20  ;;  %v1617_v9 = vld [vmem:[%s333_s24] sm:$0xff] }
  0x64   : > { %v1498_v14 = vld [vmem:[#allocation7 + $0x160] sm:$0xf]  ;;  %v1663_v15 = vld [vmem:[#allocation7 + $0x164] sm:$0xf0]  ;;  %771 = vmatpush.bf16.msra.mxu2 %v1507_v8  ;;  %v1435_v16 = vor.u32 %v1647_v13, %v1434_v11  ;;  %v1629_v19 = vld [vmem:[#allocation7 + $0x54] sm:$0xf0] }
  0x65   : > { %v1499_v17 = vor.u32 %v1663_v15, %v1498_v14  ;;  %v1426_v20 = vld [vmem:[#allocation7 + $0xd0] sm:$0xf]  ;;  %v1645_v21 = vld [vmem:[#allocation7 + $0xd4] sm:$0xf0]  ;;  %v1363_v24 = vor.u32 %v1629_v19, %v1362_v18  ;;  %s391_s8 = sand.u32 1, %s390_s14  ;;  %vm425_vm0 = vcmask 1045504  }
  0x66   : > { %v1490_v22 = vld [vmem:[#allocation7 + $0x150] sm:$0xf]  ;;  %v1661_v23 = vld [vmem:[#allocation7 + $0x154] sm:$0xf0]  ;;  %736 = vmatpush.bf16.msra.mxu0 %v1371_v12  ;;  %v1427_v25 = vor.u32 %v1645_v21, %v1426_v20  ;;  %v1354_v27 = vld [vmem:[#allocation7 + $0x40] sm:$0xf] }
  0x67   : > { %754 = vmatpush.bf16.msra.mxu1 %v1435_v16  ;;  %v1491_v26 = vor.u32 %v1661_v23, %v1490_v22  ;;  %v1627_v28 = vld [vmem:[#allocation7 + $0x44] sm:$0xf0]  ;;  %v1418_v29 = vld [vmem:[#allocation7 + $0xc0] sm:$0xf]  ;;  %s392_s10 = sadd.s32 32767, %s391_s8  ;;  %vm421_vm1 = vcmask 1046528  }
  0x68   : > { %772 = vmatpush.bf16.msra.mxu2 %v1499_v17  ;;  %v1643_v30 = vld [vmem:[#allocation7 + $0xc4] sm:$0xf0]  ;;  %v1482_v31 = vld [vmem:[#allocation7 + $0x140] sm:$0xf]  ;;  %v1355_v33 = vor.u32 %v1627_v28, %v1354_v27  ;;  %v1346_v36 = vld [vmem:[#allocation7 + $0x30] sm:$0xf]  ;;  %s393_s4 = sadd.s32 %s392_s10, %s2343_s20 }
  0x69   : > { %v1659_v32 = vld [vmem:[#allocation7 + $0x144] sm:$0xf0]  ;;  %v1419_v34 = vor.u32 %v1643_v30, %v1418_v29  ;;  %v1625_v37 = vld [vmem:[#allocation7 + $0x34] sm:$0xf0]  ;;  %v1410_v38 = vld [vmem:[#allocation7 + $0xb0] sm:$0xf] }
  0x6a   : > { %737 = vmatpush.bf16.msra.mxu0 %v1363_v24  ;;  %v1483_v35 = vor.u32 %v1659_v32, %v1482_v31  ;;  %v1641_v39 = vld [vmem:[#allocation7 + $0xb4] sm:$0xf0]  ;;  %v1474_v40 = vld [vmem:[#allocation7 + $0x130] sm:$0xf]  ;;  %v1347_v42 = vor.u32 %v1625_v37, %v1346_v36  ;;  %v1338_v43 = vld [vmem:[#allocation7 + $0x20] sm:$0xf] }
  0x6b   : > { %755 = vmatpush.bf16.msra.mxu1 %v1427_v25  ;;  %v1657_v41 = vld [vmem:[#allocation7 + $0x134] sm:$0xf0]  ;;  %v1623_v44 = vld [vmem:[#allocation7 + $0x24] sm:$0xf0]  ;;  %v1402_v45 = vld [vmem:[#allocation7 + $0xa0] sm:$0xf]  ;;  %v1411_v46 = vor.u32 %v1641_v39, %v1410_v38 }
  0x6c   : > { %773 = vmatpush.bf16.msra.mxu2 %v1491_v26  ;;  %v1475_v47 = vor.u32 %v1657_v41, %v1474_v40  ;;  %v1639_v48 = vld [vmem:[#allocation7 + $0xa4] sm:$0xf0]  ;;  %v1466_v49 = vld [vmem:[#allocation7 + $0x120] sm:$0xf]  ;;  %s394_s6 = sand.u32 4294901760, %s393_s4  ;;  %v1339_v52 = vor.u32 %v1623_v44, %v1338_v43  ;;  %v2356_v30 = vrot.slane %v1617_v9, 2 }
  0x6d   : > { %v1655_v50 = vld [vmem:[#allocation7 + $0x124] sm:$0xf0]  ;;  %s2527_s6 = smov (%p389_p4, %s394_s6), 2143289344  ;;  %v1330_v53 = vld [vmem:[#allocation7 + $0x10] sm:$0xf]  ;;  %v1403_v54 = vor.u32 %v1639_v48, %v1402_v45  ;;  %v423_v31 = vrot.slane %v1617_v9, 1 }
  0x6e   : > { %738 = vmatpush.bf16.msra.mxu0 %v1355_v33  ;;  %s397_s11 = sshrl.u32 %s2527_s6, 16  ;;  %v1467_v55 = vor.u32 %v1655_v50, %v1466_v49  ;;  %v1621_v56 = vld [vmem:[#allocation7 + $0x14] sm:$0xf0]  ;;  %v1394_v57 = vld [vmem:[#allocation7 + $0x90] sm:$0xf]  ;;  %v2361_v45 = vrot.slane %v2356_v30, 2 }
  0x6f   : > { %756 = vmatpush.bf16.msra.mxu1 %v1419_v34  ;;  %s400_s18 = sshll.u32 %s397_s11, 16  ;;  %v1637_v58 = vld [vmem:[#allocation7 + $0x94] sm:$0xf0]  ;;  %v1458_v59 = vld [vmem:[#allocation7 + $0x110] sm:$0xf]  ;;  %v1331_v2 = vor.u32 %v1621_v56, %v1330_v53  ;;  %v2358_v44 = vrot.slane %v423_v31, 2 }
  0x70   : > { %774 = vmatpush.bf16.msra.mxu2 %v1483_v35  ;;  %v1653_v60 = vld [vmem:[#allocation7 + $0x114] sm:$0xf0]  ;;  %s401_s19 = sor.u32 %s400_s18, %s397_s11  ;;  %v1322_v63 = vld [vmem:[#allocation7] sm:$0xf]  ;;  %v1619_v0 = vld [vmem:[#allocation7 + $0x4] sm:$0xf0]  ;;  %v1395_v7 = vor.u32 %v1637_v58, %v1394_v57 }
  0x71   : > { %v402_v1 = vstv %s401_s19  ;;  %v1386_v3 = vld [vmem:[#allocation7 + $0x80] sm:$0xf]  ;;  %v1632_v5 = vld [vmem:[#allocation7 + $0x74] sm:$0xf]  ;;  %v1380_v6 = vld [vmem:[#allocation7 + $0x78] sm:$0xf0]  ;;  %v1459_v8 = vor.u32 %v1653_v60, %v1458_v59  ;;  %v1323_v22 = vor.u32 %v1619_v0, %v1322_v63 }
  0x72   : > { %739 = vmatpush.bf16.msra.mxu0 %v1347_v42  ;;  %v406_v4 = vunpack.c.l.bf16 %v402_v1  ;;  %v1383_v10 = vor.u32 %v1632_v5, %v1380_v6  ;;  %v1630_v11 = vld [vmem:[#allocation7 + $0x64] sm:$0xf]  ;;  %v1372_v12 = vld [vmem:[#allocation7 + $0x68] sm:$0xf0]  ;;  %v1635_v13 = vld [vmem:[#allocation7 + $0x84] sm:$0xf0] }
  0x73   : > { %757 = vmatpush.bf16.msra.mxu1 %v1411_v46  ;;  %v1450_v14 = vld [vmem:[#allocation7 + $0x100] sm:$0xf]  ;;  %v1651_v15 = vld [vmem:[#allocation7 + $0x104] sm:$0xf0]  ;;  %v1648_v18 = vld [vmem:[#allocation7 + $0xf4] sm:$0xf]  ;;  %v1375_v20 = vor.u32 %v1630_v11, %v1372_v12  ;;  %v1387_v28 = vor.u32 %v1635_v13, %v1386_v3 }
  0x74   : > { %775 = vmatpush.bf16.msra.mxu2 %v1475_v47  ;;  %v407_v16 = vmul.f32 %v1692_v61, %v406_v4  ;;  %v408_v17 = vmul.f32 %v1693_v62, %v406_v4  ;;  %789 = vmatpush.bf16.msra.mxu3 %v1383_v10  ;;  %v1444_v19 = vld [vmem:[#allocation7 + $0xf8] sm:$0xf0]  ;;  %v1628_v21 = vld [vmem:[#allocation7 + $0x54] sm:$0xf]  ;;  %v1451_v29 = vor.u32 %v1651_v15, %v1450_v14  ;;  %v1646_v35 = vld [vmem:[#allocation7 + $0xe4] sm:$0xf] }
  0x75   : > { %v1364_v25 = vld [vmem:[#allocation7 + $0x58] sm:$0xf0]  ;;  %v1664_v26 = vld [vmem:[#allocation7 + $0x174] sm:$0xf]  ;;  %v1447_v34 = vor.u32 %v1648_v18, %v1444_v19  ;;  %v1436_v37 = vld [vmem:[#allocation7 + $0xe8] sm:$0xf0] }
  0x76   : > { %740 = vmatpush.bf16.msra.mxu0 %v1339_v52  ;;  %v409_v23 = vpack.c.bf16 %v407_v16, %v407_v16  ;;  %v410_v24 = vpack.c.bf16 %v408_v17, %v408_v17  ;;  %v1508_v27 = vld [vmem:[#allocation7 + $0x178] sm:$0xf0]  ;;  %v1367_v38 = vor.u32 %v1628_v21, %v1364_v25  ;;  %v1662_v39 = vld [vmem:[#allocation7 + $0x164] sm:$0xf]  ;;  %v1500_v40 = vld [vmem:[#allocation7 + $0x168] sm:$0xf0]  ;;  %v1439_v48 = vor.u32 %v1646_v35, %v1436_v37 }
  0x77   : > { %758 = vmatpush.bf16.msra.mxu1 %v1403_v54  ;;  %v1511_v36 = vor.u32 %v1664_v26, %v1508_v27  ;;  %v1626_v42 = vld [vmem:[#allocation7 + $0x44] sm:$0xf]  ;;  %v1356_v43 = vld [vmem:[#allocation7 + $0x48] sm:$0xf0]  ;;  %v1644_v49 = vld [vmem:[#allocation7 + $0xd4] sm:$0xf]  ;;  %v1503_v50 = vor.u32 %v1662_v39, %v1500_v40 }
  0x78   : > { %776 = vmatpush.bf16.msra.mxu2 %v1467_v55  ;;  %v413_v32 = vunpack.c.l.b16 %v409_v23  ;;  %v414_v33 = vunpack.c.l.b16 %v410_v24  ;;  %790 = vmatpush.bf16.msra.mxu3 %v1375_v20  ;;  %v1428_v51 = vld [vmem:[#allocation7 + $0xd8] sm:$0xf0]  ;;  %v1359_v52 = vor.u32 %v1626_v42, %v1356_v43  ;;  %v1660_v53 = vld [vmem:[#allocation7 + $0x154] sm:$0xf]  ;;  %v1642_v62 = vld [vmem:[#allocation7 + $0xc4] sm:$0xf] }
  0x79   : > { %v1492_v54 = vld [vmem:[#allocation7 + $0x158] sm:$0xf0]  ;;  %v1624_v57 = vld [vmem:[#allocation7 + $0x34] sm:$0xf]  ;;  %v1431_v61 = vor.u32 %v1644_v49, %v1428_v51  ;;  %v1658_v4 = vld [vmem:[#allocation7 + $0x144] sm:$0xf] }
  0x7a   : > { %741 = vmatpush.bf16.msra.mxu0 %v1331_v2  ;;  %v415_v41 = vpack.c.b16 %v414_v33, %v413_v32  ;;  %v1348_v58 = vld [vmem:[#allocation7 + $0x38] sm:$0xf0]  ;;  %v1495_v63 = vor.u32 %v1660_v53, %v1492_v54  ;;  %v1420_v2 = vld [vmem:[#allocation7 + $0xc8] sm:$0xf0]  ;;  %v1622_v6 = vld [vmem:[#allocation7 + $0x24] sm:$0xf] }
  0x7b   : > { %759 = vmatpush.bf16.msra.mxu1 %v1395_v7  ;;  %v1351_v3 = vor.u32 %v1624_v57, %v1348_v58  ;;  %v1484_v5 = vld [vmem:[#allocation7 + $0x148] sm:$0xf0]  ;;  %v1640_v9 = vld [vmem:[#allocation7 + $0xb4] sm:$0xf]  ;;  %v1412_v11 = vld [vmem:[#allocation7 + $0xb8] sm:$0xf0] }
  0x7c   : > { %777 = vmatpush.bf16.msra.mxu2 %v1459_v8  ;;  %v426_v46 = vrot.slane %v415_v41, 2  ;;  %v422_v47 = vrot.slane %v415_v41, 1  ;;  %791 = vmatpush.bf16.msra.mxu3 %v1367_v38  ;;  %v1340_v7 = vld [vmem:[#allocation7 + $0x28] sm:$0xf0]  ;;  %v1423_v8 = vor.u32 %v1642_v62, %v1420_v2  ;;  %v1487_v10 = vor.u32 %v1658_v4, %v1484_v5  ;;  %v1656_v13 = vld [vmem:[#allocation7 + $0x134] sm:$0xf] }
  0x7d   : > { %v1343_v12 = vor.u32 %v1622_v6, %v1340_v7  ;;  %v1476_v14 = vld [vmem:[#allocation7 + $0x138] sm:$0xf0]  ;;  %v1620_v15 = vld [vmem:[#allocation7 + $0x14] sm:$0xf]  ;;  %v1415_v17 = vor.u32 %v1640_v9, %v1412_v11  ;;  %v1638_v18 = vld [vmem:[#allocation7 + $0xa4] sm:$0xf] }
  0x7e   : > { %742 = vmatpush.bf16.msra.mxu0 %v1323_v22  ;;  %v2365_v55 = vsel %vm425_vm0, %v426_v46, %v2356_v30  ;;  %v424_v56 = vsel %vm421_vm1, %v422_v47, %v423_v31  ;;  %v1332_v16 = vld [vmem:[#allocation7 + $0x18] sm:$0xf0]  ;;  %v1479_v19 = vor.u32 %v1656_v13, %v1476_v14  ;;  %v1404_v20 = vld [vmem:[#allocation7 + $0xa8] sm:$0xf0]  ;;  %v1654_v22 = vld [vmem:[#allocation7 + $0x124] sm:$0xf] }
  0x7f   : > { %760 = vmatpush.bf16.msra.mxu1 %v1387_v28  ;;  %v486_v59 = vrot.slane %v2365_v55, 2  ;;  %v483_v60 = vrot.slane %v424_v56, 2  ;;  %v1335_v21 = vor.u32 %v1620_v15, %v1332_v16  ;;  %v1468_v23 = vld [vmem:[#allocation7 + $0x128] sm:$0xf0]  ;;  %v1618_v24 = vld [vmem:[#allocation7 + $0x4] sm:$0xf]  ;;  %v1407_v26 = vor.u32 %v1638_v18, %v1404_v20 }
  0x80   : > { %778 = vmatpush.bf16.msra.mxu2 %v1451_v29  ;;  %792 = vmatpush.bf16.msra.mxu3 %v1359_v52  ;;  %v1324_v25 = vld [vmem:[#allocation7 + $0x8] sm:$0xf0]  ;;  %v1471_v27 = vor.u32 %v1654_v22, %v1468_v23  ;;  %v1636_v28 = vld [vmem:[#allocation7 + $0x94] sm:$0xf]  ;;  %v1396_v29 = vld [vmem:[#allocation7 + $0x98] sm:$0xf0] }
  0x81   : > { %743 = vmatmul.bf16.vlgmr.msra.gmra.mxu0 %v2365_v55  ;;  %v485_v0 = vsel %vm425_vm0, %v483_v60, %v2358_v44  ;;  %v2374_v1 = vsel %vm425_vm0, %v486_v59, %v2361_v45  ;;  %v1327_v31 = vor.u32 %v1618_v24, %v1324_v25  ;;  %v1399_v32 = vor.u32 %v1636_v28, %v1396_v29  ;;  %v1634_v33 = vld [vmem:[#allocation7 + $0x84] sm:$0xf]  ;;  %v1460_v37 = vld [vmem:[#allocation7 + $0x118] sm:$0xf0]  ;;  %v1452_v42 = vld [vmem:[#allocation7 + $0x108] sm:$0xf0] }
  0x82   : > { %806 = vmatpush.bf16.msrb.mxu0 %v1447_v34  ;;  %761 = vmatmul.bf16.vlgmr.msra.gmra.mxu1 %v485_v0  ;;  %v1388_v34 = vld [vmem:[#allocation7 + $0x88] sm:$0xf0]  ;;  %v1689_v39 = vld [vmem:[#allocation8 + $0xb8] sm:$0xff]  ;;  %v1650_v41 = vld [vmem:[#allocation7 + $0x104] sm:$0xf]  ;;  %s1512_s9 = sshll.u32 %s2073_s27, 4 }
  0x83   : > { %823 = vmatpush.bf16.msrb.mxu1 %v1511_v36  ;;  %779 = vmatmul.bf16.vlgmr.msra.gmra.mxu2 %v2374_v1  ;;  %v1391_v35 = vor.u32 %v1634_v33, %v1388_v34  ;;  %v1652_v36 = vld [vmem:[#allocation7 + $0x114] sm:$0xf]  ;;  %v1673_v40 = vld [vmem:[#allocation8 + $0x38] sm:$0xff]  ;;  %v1455_v43 = vor.u32 %v1650_v41, %v1452_v42  ;;  %v1671_v49 = vld [vmem:[#allocation8 + $0x28] sm:$0xff]  ;;  %s1513_s16 = sadd.s32 4294967288, %s1512_s9  ;;  %s2502_s0 = sld [smem:[#allocation17_spill]] }
  0x84   : > { %793 = vmatpush.bf16.msra.mxu3 %v1351_v3  ;;  %v1463_v38 = vor.u32 %v1652_v36, %v1460_v37  ;;  %v1688_v46 = vld [vmem:[#allocation8 + $0xb0] sm:$0xff]  ;;  %1088 = vmatpush.bf16.msrb.mxu2 %v1673_v40  ;;  %v1681_v47 = vld [vmem:[#allocation8 + $0x78] sm:$0xff]  ;;  %v1679_v51 = vld [vmem:[#allocation8 + $0x68] sm:$0xff]  ;;  %v849_v14 = vstv %s1513_s16  ;;  %s2503_s12 = sld [smem:[#allocation26_spill]]  ;;  %s1612_s24 = sshll.u32 %s2073_s27, 1 }
  0x85   : > { %v1670_v52 = vld [vmem:[#allocation8 + $0x20] sm:$0xff]  ;;  %v1685_v53 = vld [vmem:[#allocation8 + $0x98] sm:$0xff]  ;;  %v1684_v56 = vld [vmem:[#allocation8 + $0x90] sm:$0xff]  ;;  %s2504_s6 = sld [smem:[#allocation27_spill]]  ;;  %s377_s27 = scalar_lea.vmem [#allocation10], %s2327_s28 }
  0x86   : > { %807 = vmatpush.bf16.msrb.mxu0 %v1439_v48  ;;  %v1672_v48 = vld [vmem:[#allocation8 + $0x30] sm:$0xff]  ;;  %v1678_v54 = vld [vmem:[#allocation8 + $0x60] sm:$0xff]  ;;  %v1677_v57 = vld [vmem:[#allocation8 + $0x58] sm:$0xff]  ;;  %s1155_s18 = sshll.u32 %s377_s27, 4  ;;  %s1141_s17 = scalar_lea.sflag [#allocation4], %s331_s15  ;;  %s1156_s18 = int_to_ptr.vmem [resolvable:$true] %s1155_s18 }
  0x87   : > { %824 = vmatpush.bf16.msrb.mxu1 %v1503_v50  ;;  %v1686_v50 = vld [vmem:[#allocation8 + $0xa0] sm:$0xff]  ;;  %v1668_v58 = vld [vmem:[#allocation8 + $0x10] sm:$0xff]  ;;  %v1683_v59 = vld [vmem:[#allocation8 + $0x88] sm:$0xff] }
  0x88   : > { %794 = vmatpush.bf16.msra.mxu3 %v1343_v12  ;;  %1089 = vmatpush.bf16.msrb.mxu2 %v1672_v48  ;;  %v1676_v60 = vld [vmem:[#allocation8 + $0x50] sm:$0xff]  ;;  %v1666_v3 = vld [vmem:[#allocation8] sm:$0xff] }
  0x89   : > { %v1674_v5 = vld [vmem:[#allocation8 + $0x40] sm:$0xff]  ;;  %s1613_s20 = sshll.u32 %s2502_s0, 2 }
  0x8a   : > { %808 = vmatpush.bf16.msrb.mxu0 %v1431_v61  ;;  %v1667_v61 = vld [vmem:[#allocation8 + $0x8] sm:$0xff]  ;;  %s1152_s14 = sadd.s32 %s1613_s20, %s1612_s24 }
  0x8b   : > { %825 = vmatpush.bf16.msrb.mxu1 %v1495_v63  ;;  %v1682_v63 = vld [vmem:[#allocation8 + $0x80] sm:$0xff]  ;;  %s1614_s8 = sshll.u32 %s1152_s14, 2  ;;  %s1974_s28 = scalar_lea.hbm %s2504_s6, 32 }
  0x8c   : > { %795 = vmatpush.bf16.msra.mxu3 %v1335_v21  ;;  %1090 = vmatpush.bf16.msrb.mxu2 %v1671_v49  ;;  %s1154_s11 = scalar_lea.hbm %s2504_s6, %s1614_s8 }
  0x8d   : > { %s1157_s19 = sshll.u32 %s1154_s11, 4  ;;  %s1158_s19 = int_to_ptr.hbm [resolvable:$true] %s1157_s19 }
  0x8e   : > { %809 = vmatpush.bf16.msrb.mxu0 %v1423_v8  ;;  %s1968_s13 = sshra.s32 %s1158_s19, 4  ;;  %s1969_s13 = int_to_ptr.hbm [resolvable:$true] %s1968_s13 }
  0x8f   : > { %826 = vmatpush.bf16.msrb.mxu1 %v1487_v10  ;;  %s1970_s9 = scalar_lea.hbm %s1969_s13, 8  ;;  %p1975_p10 = scmp.lt.s32.totalorder %s1969_s13, %s2504_s6 }
  0x90   : > { %796 = vmatpush.bf16.msra.mxu3 %v1327_v31  ;;  %1091 = vmatpush.bf16.msrb.mxu2 %v1670_v52  ;;  %p1971_p7 = scmp.ne.s32.totalorder %s1969_s13, %s1970_s9  ;;  %p1976_p12 = scmp.lt.s32.totalorder %s1974_s28, %s1970_s9 }
  0x91   : > { %748 = vmatmul.bf16.gmra.mxu0 %v2356_v30 }
  0x92   : > { %810 = vmatpush.bf16.msrb.mxu0 %v1415_v17  ;;  %766 = vmatmul.bf16.gmra.mxu1 %v2358_v44  ;;  %p1972_p5 = pnand %p1971_p7, %p2304_p13  ;;  %p1977_p3 = por %p1976_p12, %p1975_p10 }
  0x93   : > { %827 = vmatpush.bf16.msrb.mxu1 %v1479_v19  ;;  %784 = vmatmul.bf16.gmra.mxu2 %v2361_v45 }
  0x94   : > { %797 = vmatmul.bf16.vlgmr.msra.gmra.mxu3 %v2365_v55  ;;  %v1669_v55 = vld [vmem:[#allocation8 + $0x18] sm:$0xff]  ;;  %p1973_p0 = pneg %p1972_p5 }
  0x95   : > { %1102 = vmatpush.bf16.msrb.mxu3 %v1681_v47  ;;  %1092 = vmatpush.bf16.msrb.mxu2 %v1669_v55 }
  0x96   : > { %811 = vmatpush.bf16.msrb.mxu0 %v1407_v26  ;;  %p1978_p2 = pnand %p1977_p3, %p1973_p0 }
  0x97   : > { %828 = vmatpush.bf16.msrb.mxu1 %v1471_v27 }
  0x99   : > { %1093 = vmatpush.bf16.msrb.mxu2 %v1668_v58 }
  0x9a   : > { %812 = vmatpush.bf16.msrb.mxu0 %v1399_v32 }
  0x9b   : > { %829 = vmatpush.bf16.msrb.mxu1 %v1463_v38 }
  0x9d   : > { %1094 = vmatpush.bf16.msrb.mxu2 %v1667_v61 }
  0x9e   : > { %813 = vmatpush.bf16.msrb.mxu0 %v1391_v35 }
  0x9f   : > { %830 = vmatpush.bf16.msrb.mxu1 %v1455_v43 }
  0xa1   : > { %814 = vmatmul.bf16.vlgmr.msrb.gmra.mxu0 %v485_v0  ;;  %v2388_v0 = vld [vmem:[%s2457_s3] sm:$0x3]  ;;  %1095 = vmatpush.bf16.msrb.mxu2 %v1666_v3 }
  0xa2   : > { %1116 = vmatpush.bf16.msra.mxu0 %v1689_v39  ;;  %831 = vmatmul.bf16.vlgmr.msrb.gmra.mxu1 %v2374_v1  ;;  %v1675_v1 = vld [vmem:[#allocation8 + $0x48] sm:$0xff]  ;;  %v479_v4 = vperm.slane %v2388_v0, 0 }
  0xa4   : > { %801 = vmatmul.bf16.gmra.mxu3 %v2356_v30  ;;  %v1687_v30 = vld [vmem:[#allocation8 + $0xa8] sm:$0xff] }
  0xa6   : > { %1117 = vmatpush.bf16.msra.mxu0 %v1688_v46 }
  0xaa   : > { %1118 = vmatpush.bf16.msra.mxu0 %v1687_v30 }
  0xae   : > { %1119 = vmatpush.bf16.msra.mxu0 %v1686_v50 }
  0xb1   : > { %818 = vmatmul.bf16.gmra.mxu0 %v2358_v44  ;;  %v1680_v44 = vld [vmem:[#allocation8 + $0x70] sm:$0xff] }
  0xb2   : > { %1103 = vmatpush.bf16.msrb.mxu3 %v1680_v44  ;;  %1120 = vmatpush.bf16.msra.mxu0 %v1685_v53 }
  0xb3   : > { %835 = vmatmul.bf16.gmra.mxu1 %v2361_v45  ;;  %v843_v45 = vlaneseq }
  0xb5   : > { %v844_v9 = vshrl.u32 %v843_v45, 7 }
  0xb6   : > { %1104 = vmatpush.bf16.msrb.mxu3 %v1679_v51  ;;  %1121 = vmatpush.bf16.msra.mxu0 %v1684_v56 }
  0xb7   : > { %v845_v11 = vadd.s32 8, %v844_v9  ;;  %v850_v19 = vadd.s32 %v849_v14, %v844_v9  ;;  %v846_v24 = vadd.s32 16, %v844_v9 }
  0xb9   : > { %v851_v15 = vadd.s32 %v849_v14, %v845_v11  ;;  %vm853_vm3 = vcmp.ge.s32.totalorder %v850_v19, 0  ;;  %v852_v29 = vadd.s32 %v849_v14, %v846_v24 }
  0xba   : > { %1105 = vmatpush.bf16.msrb.mxu3 %v1678_v54  ;;  %1122 = vmatpush.bf16.msra.mxu0 %v1683_v59 }
  0xbb   : > { %vm854_vm2 = vcmp.ge.s32.totalorder %v851_v15, 0  ;;  %vm855_vm4 = vcmp.ge.s32.totalorder %v852_v29, 0 }
  0xbe   : > { %1106 = vmatpush.bf16.msrb.mxu3 %v1677_v57  ;;  %1123 = vmatpush.bf16.msra.mxu0 %v1682_v63 }
  0xc2   : > { %1107 = vmatpush.bf16.msrb.mxu3 %v1676_v60  ;;  %v480_v60 = vperm.slane %v2388_v0, 1  ;;  %v1833_v0 = vld [vmem:[%s2503_s12] ss:$0 sm:$0xff] }
  0xc6   : > { %1108 = vmatpush.bf16.msrb.mxu3 %v1675_v1 }
  0xca   : > { %1109 = vmatpush.bf16.msrb.mxu3 %v1674_v5 }
  0xfe   : > { %v744_v62 = vpop.f32.mrf.mxu0 }
  0xff   : > { %v762_v2 = vpop.f32.mrf.mxu1  ;;  %v745_v6 = vadd.f32 %v744_v62, %v479_v4 }
 0x101   : > { %v763_v12 = vadd.f32 %v762_v2, %v745_v6 }
 0x106   : > { %v746_v7 = vpop.f32.mrf.mxu0  ;;  %v780_v8 = vpop.f32.mrf.mxu2 }
 0x107   : > { %v764_v10 = vpop.f32.mrf.mxu1  ;;  %v747_v13 = vadd.f32 %v746_v7, %v479_v4  ;;  %v781_v16 = vadd.f32 %v780_v8, %v763_v12 }
 0x109   : > { %v765_v17 = vadd.f32 %v764_v10, %v747_v13  ;;  %v840_v25 = vmax.f32 %v781_v16, 0.0 }
 0x10b   : > { %v862_v31 = vsel %vm853_vm3, %v840_v25, 0.0 }
 0x10c   : > { %v865_v36 = vpack.c.bf16 %v862_v31, %v862_v31 }
 0x10e   : > { %v749_v18 = vpop.f32.mrf.mxu0  ;;  %v782_v20 = vpop.f32.mrf.mxu2  ;;  %v871_v42 = vunpack.c.l.b16 %v865_v36 }
 0x10f   : > { %v783_v21 = vadd.f32 %v782_v20, %v765_v17  ;;  %v750_v22 = vadd.f32 %v749_v18, %v479_v4  ;;  %v767_v23 = vpop.f32.mrf.mxu1 }
 0x111   : > { %v841_v26 = vmax.f32 %v783_v21, 0.0  ;;  %v768_v28 = vadd.f32 %v767_v23, %v750_v22 }
 0x113   : > { %v863_v27 = vsel %vm854_vm2, %v841_v26, 0.0 }
 0x114   : > { %v866_v33 = vpack.c.bf16 %v863_v27, %v863_v27 }
 0x116   : > { %v751_v32 = vpop.f32.mrf.mxu0  ;;  %v785_v34 = vpop.f32.mrf.mxu2  ;;  %v872_v40 = vunpack.c.l.b16 %v866_v33 }
 0x117   : > { %v786_v35 = vadd.f32 %v785_v34, %v768_v28  ;;  %v769_v37 = vpop.f32.mrf.mxu1  ;;  %v798_v38 = vpop.f32.mrf.mxu3 }
 0x118   : > { %v874_v47 = vpack.c.b16 %v872_v40, %v871_v42 }
 0x119   : > { %v842_v39 = vmax.f32 %v786_v35, 0.0 }
 0x11a   : > { %v876_v50 = vrot.slane %v874_v47, 1  ;;  %v933_v52 = vrot.slane %v874_v47, 2 }
 0x11b   : > { %v864_v41 = vsel %vm855_vm4, %v842_v39, 0.0 }
 0x11c   : > { %v867_v43 = vpack.c.bf16 %v864_v41, %v864_v41 }
 0x11e   : > { %v815_v46 = vpop.f32.mrf.mxu0  ;;  %v873_v48 = vunpack.c.l.b16 %v867_v43  ;;  %v787_v30 = vpop.f32.mrf.mxu2 }
 0x11f   : > { %v799_v61 = vpop.f32.mrf.mxu3  ;;  %v832_v6 = vpop.f32.mrf.mxu1 }
 0x120   : > { %v875_v44 = vpack.c.b16 %v873_v48, %v873_v48  ;;  %v879_v49 = vpack.c.b16 %v873_v48, %v872_v40  ;;  %v800_v63 = vadd.f32 %v799_v61, %v480_v60 }
 0x122   : > { %v877_v51 = vrot.slane %v875_v44, 1  ;;  %1124 = vmatmul.bf16.vlgmr.msra.gmra.mxu0 %v879_v49  ;;  %v934_v53 = vrot.slane %v875_v44, 2 }
 0x124   : > { %v935_v54 = vsel %vm425_vm0, %v933_v52, %v934_v53  ;;  %v878_v55 = vsel %vm421_vm1, %v876_v50, %v877_v51  ;;  %v937_v56 = vrot.slane %v877_v51, 2 }
 0x125   : > { %1096 = vmatmul.bf16.vlgmr.msrb.gmra.mxu2 %v935_v54  ;;  %v936_v57 = vrot.slane %v878_v55, 2 }
 0x126   : > { %v816_v59 = vpop.f32.mrf.mxu0 }
 0x127   : > { %v938_v58 = vsel %vm425_vm0, %v936_v57, %v937_v56  ;;  %v817_v1 = vadd.f32 %v816_v59, %v800_v63  ;;  %v802_v3 = vpop.f32.mrf.mxu3  ;;  %v833_v7 = vpop.f32.mrf.mxu1 }
 0x128   : > { %1110 = vmatmul.bf16.vlgmr.msrb.gmra.mxu3 %v938_v58  ;;  %v803_v4 = vadd.f32 %v802_v3, %v480_v60 }
 0x129   : > { %v834_v8 = vadd.f32 %v833_v7, %v817_v1 }
 0x12e   : > { %v819_v62 = vpop.f32.mrf.mxu0 }
 0x12f   : > { %v820_v45 = vadd.f32 %v819_v62, %v803_v4  ;;  %v804_v5 = vpop.f32.mrf.mxu3 }
 0x130   : > { %v836_v9 = vpop.f32.mrf.mxu1 }
 0x131   : > { %v837_v10 = vadd.f32 %v836_v9, %v820_v45 }
 0x136   : > { %v821_v2 = vpop.f32.mrf.mxu0 }
 0x138   : > { %v838_v11 = vpop.f32.mrf.mxu1 }
 0x19f   : > { %v1125_v14 = vpop.f32.mrf.mxu0 }
 0x1a7   : > { %v1127_v23 = vpop.f32.mrf.mxu0 }
 0x1a8   : > { %v1097_v12 = vpop.f32.mrf.mxu2 }
 0x1a9   : > { %v1098_v13 = vadd.f32 %v1833_v0, %v1097_v12 }
 0x1ab   : > { %v1111_v15 = vpop.f32.mrf.mxu3 }
 0x1ac   : > { %v1112_v16 = vadd.f32 %v1111_v15, %v1098_v13 }
 0x1ae   : > { %v1126_v17 = vadd.f32 %v1125_v14, %v1112_v16 }
 0x1b0   : > { %v1099_v18 = vpop.f32.mrf.mxu2  ;;  %v1130_v21 = vmax.f32 %v1126_v17, 0.0 }
 0x1b1   : > { %v1100_v19 = vadd.f32 %v1833_v0, %v1099_v18 }
 0x1b2   : > { %v1132_v25 = vadd.f32 %v1130_v21, %v834_v8 }
 0x1b3   : > { %v1113_v20 = vpop.f32.mrf.mxu3 }
 0x1b4   : > { %v1114_v22 = vadd.f32 %v1113_v20, %v1100_v19  ;;  %v1134_v28 = vmax.f32 %v1132_v25, 0.0 }
 0x1b6   : > { %v1128_v24 = vadd.f32 %v1127_v23, %v1114_v22 }
 0x1b8   : > { %v1131_v26 = vmax.f32 %v1128_v24, 0.0 }
 0x1ba   : > { %v1133_v27 = vadd.f32 %v1131_v26, %v837_v10 }
 0x1bc   : > { %v1135_v29 = vmax.f32 %v1133_v27, 0.0 }
 0x1be   : > { %v1697_v31 = vpack.c.bf16 %v1135_v29, %v1134_v28 }
 0x1c0   : > { %1698 = vst [vmem:[%s377_s27] sm:$0xff] %v1697_v31  }
 0x1c1   : > { %1981 = shalt.err (!%p1978_p2)
}
 0x1c2   : > { %s2097_s15 = smov 64   ;;  %s2098_s12 = smov 4  }
 0x1c3   : > { %1711 = dma.vmem_to_hbm [thread:$0]  (%p2304_p13), %s1156_s18, 128, %s1158_s19, %s1141_s17, %s2097_s15, %s2097_s15, %s2098_s12  }
 0x1c4 PF: > { %s2505_s24 = sld [smem:[#allocation16_spill]]  ;;  %p1736_p8 = scmp.ge.s32.totalorder %s2089_s7, 2 }
 0x1c6   : > { %p1728_p1 = pnand %p1736_p8, %p2204_p6 }
 0x1c8   : > { %p1729_p9 = pneg %p1728_p1 }
 0x1ca   : > { %s1172_s14 = sand.u32 1, %s2505_s24  }
 0x1cb   : > { %s1173_s8 = scalar_lea.sflag [#allocation4], %s1172_s14 }
 0x1cc   : > { %2043 = dma.done.wait (%p1729_p9), %s1173_s8, 128  }
 0x1cd   : > { %2045 = vsyncadd (%p1729_p9), %s1173_s8, 4294967168  ;;  %s26_s7 = sadd.s32 1, %s2089_s7   ;;  %s2507_s30 = sld [smem:[#allocation22_spill]] }
 0x1ce   : > { %p23_p11 = scmp.ge.s32.totalorder %s26_s7, 6   ;;  %s2508_s28 = sld [smem:[#allocation18_spill]] }
 0x1cf   : > { %s2509_s10 = sld [smem:[#allocation20_spill]]  ;;  %s2511_s21 = smov %s2053_s22 }
 0x1d0   : > { %s2510_s4 = sld [smem:[#allocation21_spill]]  ;;  %s2512_s22 = smov %s2057_s23 }
 0x1d1   : > { %s2513_s23 = smov %s2294_s5  ;;  %s2514_s24 = smov %s2065_s25 }
 0x1d2   : > { %s2515_s25 = smov %s2069_s26  ;;  %s2517_s27 = smov %s2081_s29 }
 0x1d3   : > { %s2516_s26 = smov %s2507_s30  ;;  %25 = sbr.rel (!%p23_p11) target bundleno = 18 (0x12), region = 110 }
 0x1d5   : > { %s2518_s29 = smov %s2509_s10 }
 0x1d6   : > { %s2519_s30 = smov %s2510_s4 }
 0x1d8   :  { %1179 = vsyncpa [#allocation3], 1 }
 0x1d9   :  { %1181 = vsyncpa [#allocation3 + $0x1], 1 }
 0x1da   :  { %1182 = vsyncpa [#allocation6], 1 }
 0x1db   :  { %1184 = vsyncpa [#allocation6 + $0x1], 1 }
 0x1dc   :  { %1185 = vsyncpa [#allocation9], 1 }
 0x1dd   :  { %1186 = vsyncpa [#allocation4], 1 }
 0x1de   :  { %1188 = vsyncpa [#allocation4 + $0x1], 1 }

</bundles_post_ra>
